<compile_context>
chip_gen: v7x
topology: tpu7x:2x2x1
jax: 0.10.0
libtpu: 0.0.40
codegen_flags: <defaults>
</compile_context>

<pallas_src>
import jax
import jax.numpy as jnp
from jax.experimental import pallas as pl
from jax.experimental.pallas import tpu as pltpu

IN_FEATURES = 3
OUT_FEATURES = 4
_LANE = 128           # TPU lane width; last block dim must be a multiple of it
_BATCH_TILE = 2048    # lane columns of x/y processed per grid step


def _round_up(n, m):
    return ((n + m - 1) // m) * m


def linear_kernel(w_ref, b_ref, x_ref, o_ref):
    """VPU-only linear layer with batch on the lane axis.

    w_ref: (OUT, IN) f32 in SMEM  (PyTorch nn.Linear storage order)
    b_ref: (OUT,)    f32 in SMEM
    x_ref: (IN, TB)  f32 in VMEM  (batch on lanes)
    o_ref: (OUT, TB) f32 in VMEM
    """
    x = x_ref[...]  # (IN, TB)
    # OUT x IN = 12 scalar*vector FMAs, fully unrolled. All VPU: no padded
    # MXU matmul, no cross-lane relayout. Each row store is lane-dense.
    for j in range(OUT_FEATURES):
        acc = b_ref[j] + w_ref[j, 0] * x[0:1, :]
        for k in range(1, IN_FEATURES):
            acc = acc + w_ref[j, k] * x[k:k + 1, :]
        o_ref[j:j + 1, :] = acc


@jax.jit
def testnet_forward(x, weight, bias):
    """Equivalent of TestNet.forward: x @ weight.T + bias.

    x:      (B, 3) float32
    weight: (4, 3) float32  (PyTorch nn.Linear convention: (out, in))
    bias:   (4,)   float32
    """
    B = x.shape[0]
    tb = min(_BATCH_TILE, _round_up(B, _LANE))   # tile = multiple of 128 lanes
    b_pad = _round_up(B, tb)                     # whole number of tiles

    # Layout plumbing: batch -> lanes, zero-pad to a full tile count.
    x_t = jnp.pad(x, ((0, b_pad - B), (0, 0))).T            # (IN, B_pad)

    y_t = pl.pallas_call(
        linear_kernel,
        out_shape=jax.ShapeDtypeStruct((OUT_FEATURES, b_pad), x.dtype),
        grid=(b_pad // tb,),
        in_specs=[
            pl.BlockSpec(memory_space=pltpu.MemorySpace.SMEM),  # weight (4,3)
            pl.BlockSpec(memory_space=pltpu.MemorySpace.SMEM),  # bias   (4,)
            pl.BlockSpec((IN_FEATURES, tb), lambda i: (0, i)),  # x tile
        ],
        out_specs=pl.BlockSpec((OUT_FEATURES, tb), lambda i: (0, i)),
        compiler_params=pltpu.CompilerParams(
            dimension_semantics=("parallel",),  # pure data-parallel batch axis
        ),
    )(weight, bias, x_t)

    # Back to PyTorch's (B, OUT) layout, dropping the batch padding.
    return y_t[:, :B].T


if __name__ == "__main__":
    key = jax.random.PRNGKey(0)
    kx, kw, kb, kx2 = jax.random.split(key, 4)

    # Deterministic params (mimics PyTorch Linear uniform(-1/sqrt(in), 1/sqrt(in))).
    bound = 1.0 / (IN_FEATURES ** 0.5)
    weight = jax.random.uniform(
        kw, (OUT_FEATURES, IN_FEATURES), jnp.float32, minval=-bound, maxval=bound
    )
    bias = jax.random.uniform(
        kb, (OUT_FEATURES,), jnp.float32, minval=-bound, maxval=bound
    )

    # Small primary case (single tile).
    batch = 8
    x = jax.random.normal(kx, (batch, IN_FEATURES), jnp.float32)
    out = jax.block_until_ready(testnet_forward(x, weight, bias))
    ref = x @ weight.T + bias
    assert out.shape == (batch, OUT_FEATURES)
    assert jnp.allclose(out, ref, atol=1e-5, rtol=1e-5), "mismatch vs reference (B=8)"

    # Secondary case exercising batch padding + multi-tile grid (grid > 1).
    batch2 = 1300
    x2 = jax.random.normal(kx2, (batch2, IN_FEATURES), jnp.float32)
    out2 = jax.block_until_ready(testnet_forward(x2, weight, bias))
    ref2 = x2 @ weight.T + bias
    assert out2.shape == (batch2, OUT_FEATURES)
    assert jnp.allclose(out2, ref2, atol=1e-5, rtol=1e-5), "mismatch vs reference (B=1300)"

    print("KERNEL_OK")
</pallas_src>

<mosaic_0001>
module attributes {stable_mosaic.version = 11 : i64} {
  func.func @linear_kernel(%arg0: i32, %arg1: memref<4x3xf32, #tpu.memory_space<smem>>, %arg2: memref<4xf32, #tpu.memory_space<smem>>, %arg3: memref<3x128xf32, #tpu.memory_space<vmem>>, %arg4: memref<4x128xf32, #tpu.memory_space<vmem>>) attributes {dimension_semantics = [#tpu.dimension_semantics<parallel>], iteration_bounds = array<i64: 1>, scalar_prefetch = 0 : i64, scratch_operands = 0 : i64, tpu.core_type = #tpu.core_type<tc>, window_params = [{transform_indices = @transform_0, window_bounds = array<i64: 4, 3>}, {transform_indices = @transform_1, window_bounds = array<i64: 4>}, {transform_indices = @transform_2, window_bounds = array<i64: 3, 128>}, {transform_indices = @transform_3, window_bounds = array<i64: 4, 128>}]} {
    %c0 = arith.constant 0 : index
    %c0_0 = arith.constant 0 : index
    %0 = vector.load %arg3[%c0, %c0_0] : memref<3x128xf32, #tpu.memory_space<vmem>>, vector<3x128xf32>
    %c0_1 = arith.constant 0 : index
    %1 = memref.load %arg2[%c0_1] : memref<4xf32, #tpu.memory_space<smem>>
    %c0_2 = arith.constant 0 : index
    %c0_3 = arith.constant 0 : index
    %2 = memref.load %arg1[%c0_2, %c0_3] : memref<4x3xf32, #tpu.memory_space<smem>>
    %3 = vector.extract_strided_slice %0 {offsets = [0, 0], sizes = [1, 128], strides = [1, 1]} : vector<3x128xf32> to vector<1x128xf32>
    %4 = vector.broadcast %2 : f32 to vector<1x128xf32>
    %5 = arith.mulf %4, %3 : vector<1x128xf32>
    %6 = vector.broadcast %1 : f32 to vector<1x128xf32>
    %7 = arith.addf %6, %5 : vector<1x128xf32>
    %c0_4 = arith.constant 0 : index
    %c1 = arith.constant 1 : index
    %8 = memref.load %arg1[%c0_4, %c1] : memref<4x3xf32, #tpu.memory_space<smem>>
    %9 = vector.extract_strided_slice %0 {offsets = [1, 0], sizes = [1, 128], strides = [1, 1]} : vector<3x128xf32> to vector<1x128xf32>
    %10 = vector.broadcast %8 : f32 to vector<1x128xf32>
    %11 = arith.mulf %10, %9 : vector<1x128xf32>
    %12 = arith.addf %7, %11 : vector<1x128xf32>
    %c0_5 = arith.constant 0 : index
    %c2 = arith.constant 2 : index
    %13 = memref.load %arg1[%c0_5, %c2] : memref<4x3xf32, #tpu.memory_space<smem>>
    %14 = vector.extract_strided_slice %0 {offsets = [2, 0], sizes = [1, 128], strides = [1, 1]} : vector<3x128xf32> to vector<1x128xf32>
    %15 = vector.broadcast %13 : f32 to vector<1x128xf32>
    %16 = arith.mulf %15, %14 : vector<1x128xf32>
    %17 = arith.addf %12, %16 : vector<1x128xf32>
    %c0_6 = arith.constant 0 : index
    %c0_7 = arith.constant 0 : index
    %18 = vector.load %arg4[%c0_6, %c0_7] : memref<4x128xf32, #tpu.memory_space<vmem>>, vector<1x128xf32>
    tpu.vector_store %arg4[%c0_6, %c0_7], %17 {strides = array<i32>} : memref<4x128xf32, #tpu.memory_space<vmem>>, vector<1x128xf32>,
    %c1_8 = arith.constant 1 : index
    %19 = memref.load %arg2[%c1_8] : memref<4xf32, #tpu.memory_space<smem>>
    %c1_9 = arith.constant 1 : index
    %c0_10 = arith.constant 0 : index
    %20 = memref.load %arg1[%c1_9, %c0_10] : memref<4x3xf32, #tpu.memory_space<smem>>
    %21 = vector.extract_strided_slice %0 {offsets = [0, 0], sizes = [1, 128], strides = [1, 1]} : vector<3x128xf32> to vector<1x128xf32>
    %22 = vector.broadcast %20 : f32 to vector<1x128xf32>
    %23 = arith.mulf %22, %21 : vector<1x128xf32>
    %24 = vector.broadcast %19 : f32 to vector<1x128xf32>
    %25 = arith.addf %24, %23 : vector<1x128xf32>
    %c1_11 = arith.constant 1 : index
    %c1_12 = arith.constant 1 : index
    %26 = memref.load %arg1[%c1_11, %c1_12] : memref<4x3xf32, #tpu.memory_space<smem>>
    %27 = vector.extract_strided_slice %0 {offsets = [1, 0], sizes = [1, 128], strides = [1, 1]} : vector<3x128xf32> to vector<1x128xf32>
    %28 = vector.broadcast %26 : f32 to vector<1x128xf32>
    %29 = arith.mulf %28, %27 : vector<1x128xf32>
    %30 = arith.addf %25, %29 : vector<1x128xf32>
    %c1_13 = arith.constant 1 : index
    %c2_14 = arith.constant 2 : index
    %31 = memref.load %arg1[%c1_13, %c2_14] : memref<4x3xf32, #tpu.memory_space<smem>>
    %32 = vector.extract_strided_slice %0 {offsets = [2, 0], sizes = [1, 128], strides = [1, 1]} : vector<3x128xf32> to vector<1x128xf32>
    %33 = vector.broadcast %31 : f32 to vector<1x128xf32>
    %34 = arith.mulf %33, %32 : vector<1x128xf32>
    %35 = arith.addf %30, %34 : vector<1x128xf32>
    %c1_15 = arith.constant 1 : index
    %c0_16 = arith.constant 0 : index
    %36 = vector.load %arg4[%c1_15, %c0_16] : memref<4x128xf32, #tpu.memory_space<vmem>>, vector<1x128xf32>
    tpu.vector_store %arg4[%c1_15, %c0_16], %35 {strides = array<i32>} : memref<4x128xf32, #tpu.memory_space<vmem>>, vector<1x128xf32>,
    %c2_17 = arith.constant 2 : index
    %37 = memref.load %arg2[%c2_17] : memref<4xf32, #tpu.memory_space<smem>>
    %c2_18 = arith.constant 2 : index
    %c0_19 = arith.constant 0 : index
    %38 = memref.load %arg1[%c2_18, %c0_19] : memref<4x3xf32, #tpu.memory_space<smem>>
    %39 = vector.extract_strided_slice %0 {offsets = [0, 0], sizes = [1, 128], strides = [1, 1]} : vector<3x128xf32> to vector<1x128xf32>
    %40 = vector.broadcast %38 : f32 to vector<1x128xf32>
    %41 = arith.mulf %40, %39 : vector<1x128xf32>
    %42 = vector.broadcast %37 : f32 to vector<1x128xf32>
    %43 = arith.addf %42, %41 : vector<1x128xf32>
    %c2_20 = arith.constant 2 : index
    %c1_21 = arith.constant 1 : index
    %44 = memref.load %arg1[%c2_20, %c1_21] : memref<4x3xf32, #tpu.memory_space<smem>>
    %45 = vector.extract_strided_slice %0 {offsets = [1, 0], sizes = [1, 128], strides = [1, 1]} : vector<3x128xf32> to vector<1x128xf32>
    %46 = vector.broadcast %44 : f32 to vector<1x128xf32>
    %47 = arith.mulf %46, %45 : vector<1x128xf32>
    %48 = arith.addf %43, %47 : vector<1x128xf32>
    %c2_22 = arith.constant 2 : index
    %c2_23 = arith.constant 2 : index
    %49 = memref.load %arg1[%c2_22, %c2_23] : memref<4x3xf32, #tpu.memory_space<smem>>
    %50 = vector.extract_strided_slice %0 {offsets = [2, 0], sizes = [1, 128], strides = [1, 1]} : vector<3x128xf32> to vector<1x128xf32>
    %51 = vector.broadcast %49 : f32 to vector<1x128xf32>
    %52 = arith.mulf %51, %50 : vector<1x128xf32>
    %53 = arith.addf %48, %52 : vector<1x128xf32>
    %c2_24 = arith.constant 2 : index
    %c0_25 = arith.constant 0 : index
    %54 = vector.load %arg4[%c2_24, %c0_25] : memref<4x128xf32, #tpu.memory_space<vmem>>, vector<1x128xf32>
    tpu.vector_store %arg4[%c2_24, %c0_25], %53 {strides = array<i32>} : memref<4x128xf32, #tpu.memory_space<vmem>>, vector<1x128xf32>,
    %c3 = arith.constant 3 : index
    %55 = memref.load %arg2[%c3] : memref<4xf32, #tpu.memory_space<smem>>
    %c3_26 = arith.constant 3 : index
    %c0_27 = arith.constant 0 : index
    %56 = memref.load %arg1[%c3_26, %c0_27] : memref<4x3xf32, #tpu.memory_space<smem>>
    %57 = vector.extract_strided_slice %0 {offsets = [0, 0], sizes = [1, 128], strides = [1, 1]} : vector<3x128xf32> to vector<1x128xf32>
    %58 = vector.broadcast %56 : f32 to vector<1x128xf32>
    %59 = arith.mulf %58, %57 : vector<1x128xf32>
    %60 = vector.broadcast %55 : f32 to vector<1x128xf32>
    %61 = arith.addf %60, %59 : vector<1x128xf32>
    %c3_28 = arith.constant 3 : index
    %c1_29 = arith.constant 1 : index
    %62 = memref.load %arg1[%c3_28, %c1_29] : memref<4x3xf32, #tpu.memory_space<smem>>
    %63 = vector.extract_strided_slice %0 {offsets = [1, 0], sizes = [1, 128], strides = [1, 1]} : vector<3x128xf32> to vector<1x128xf32>
    %64 = vector.broadcast %62 : f32 to vector<1x128xf32>
    %65 = arith.mulf %64, %63 : vector<1x128xf32>
    %66 = arith.addf %61, %65 : vector<1x128xf32>
    %c3_30 = arith.constant 3 : index
    %c2_31 = arith.constant 2 : index
    %67 = memref.load %arg1[%c3_30, %c2_31] : memref<4x3xf32, #tpu.memory_space<smem>>
    %68 = vector.extract_strided_slice %0 {offsets = [2, 0], sizes = [1, 128], strides = [1, 1]} : vector<3x128xf32> to vector<1x128xf32>
    %69 = vector.broadcast %67 : f32 to vector<1x128xf32>
    %70 = arith.mulf %69, %68 : vector<1x128xf32>
    %71 = arith.addf %66, %70 : vector<1x128xf32>
    %c3_32 = arith.constant 3 : index
    %c0_33 = arith.constant 0 : index
    %72 = vector.load %arg4[%c3_32, %c0_33] : memref<4x128xf32, #tpu.memory_space<vmem>>, vector<1x128xf32>
    tpu.vector_store %arg4[%c3_32, %c0_33], %71 {strides = array<i32>} : memref<4x128xf32, #tpu.memory_space<vmem>>, vector<1x128xf32>,
    return
  }
  func.func @transform_0(%arg0: i32) -> (i32, i32) {
    %c0_i32 = arith.constant 0 : i32
    %c0_i32_0 = arith.constant 0 : i32
    %c0_i32_1 = arith.constant 0 : i32
    return %c0_i32, %c0_i32_0 : i32, i32
  }
  func.func @transform_1(%arg0: i32) -> i32 {
    %c0_i32 = arith.constant 0 : i32
    %c0_i32_0 = arith.constant 0 : i32
    return %c0_i32 : i32
  }
  func.func @transform_2(%arg0: i32) -> (i32, i32) {
    %c0_i32 = arith.constant 0 : i32
    %c0_i32_0 = arith.constant 0 : i32
    return %c0_i32, %arg0 : i32, i32
  }
  func.func @transform_3(%arg0: i32) -> (i32, i32) {
    %c0_i32 = arith.constant 0 : i32
    %c0_i32_0 = arith.constant 0 : i32
    return %c0_i32, %arg0 : i32, i32
  }
}

</mosaic_0001>

<bundles_post_ra>
// kernel: testnet_forward.1
= control target key start
LH: loop header
LB: loop body
LE: loop exit
PB: predicated region body
PF: predicated region fallthrough
CT: control target
= control target key end

     0   :  { %8 = vsyncpa [#allocation3], 0  ;;  %s241_s0 = inlined_call_operand.vmem [shape: f32[4,3], index: 0, kind: input, shape index: {}]   ;;  %s242_s1 = inlined_call_operand.vmem [shape: f32[4], index: 1, kind: input, shape index: {}]   ;;  %s243_s2 = inlined_call_operand.vmem [shape: f32[3,128], index: 2, kind: input, shape index: {}]   ;;  %s244_s3 = inlined_call_operand.vmem [shape: f32[4,128], index: 3, kind: output, shape index: {}]  }
   0x1   :  { %s16_s14 = sshll.u32 %s241_s0, 4  ;;  %s17_s14 = int_to_ptr.vmem [resolvable:$true] %s16_s14 }
   0x2   :  { %9 = vsyncpa [#allocation5], 0  ;;  %s26_s17 = sshll.u32 %s242_s1, 4  ;;  %s146_s18 = scalar_lea.vmem %s17_s14, 64  ;;  %s27_s17 = int_to_ptr.vmem [resolvable:$true] %s26_s17 }
   0x3   :  { %p147_p0 = scmp.ne.s32.totalorder %s17_s14, %s146_s18  ;;  %p151_p1 = scmp.lt.s32.totalorder %s17_s14, %s17_s14 }
   0x4   :  { %p152_p2 = scmp.lt.s32.totalorder %s146_s18, %s146_s18 }
   0x6   :  { %p153_p3 = por %p152_p2, %p151_p1 }
   0x8   :  { %p154_p4 = pnand %p153_p3, %p147_p0 }
   0xa   :  { %157 = shalt.err (!%p154_p4)
}
   0xb   :  { %s174_s19 = smov [#allocation2]   ;;  %s158_s20 = scalar_lea.vmem %s27_s17, 16 }
   0xc   :  { %19 = dma.vmem_to_smem %s17_s14, 64, %s174_s19, [#allocation3]  }
   0xd   :  { %p159_p5 = scmp.ne.s32.totalorder %s27_s17, %s158_s20  ;;  %p163_p6 = scmp.lt.s32.totalorder %s27_s17, %s27_s17 }
   0xe   :  { %p164_p7 = scmp.lt.s32.totalorder %s158_s20, %s158_s20 }
  0x10   :  { %p165_p8 = por %p164_p7, %p163_p6 }
  0x12   :  { %p166_p9 = pnand %p165_p8, %p159_p5 }
  0x14   :  { %169 = shalt.err (!%p166_p9)
}
  0x15   :  { %s175_s0 = smov [#allocation4]  }
  0x16   :  { %29 = dma.vmem_to_smem %s27_s17, 16, %s175_s0, [#allocation5]  }
  0x17   :  { %170 = dma.done.wait [#allocation3], 64  }
  0x18   :  { %171 = vsyncadd [#allocation3], 4294967232 }
  0x19   :  { %172 = dma.done.wait [#allocation5], 16  }
  0x1a   :  { %173 = vsyncadd [#allocation5], 4294967280 }
  0x1b   :  { %38 = sfence }
  0x1c   :  { %s40_s1 = sld [smem:[#allocation4]]  ;;  %s130_s22 = sld [smem:[#allocation2 + $0x1]]  ;;  %v39_v0 = vld [vmem:[%s243_s2] sm:$0x7] }
  0x1d   :  { %s41_s21 = sld [smem:[#allocation2]]  ;;  %s131_s23 = sld [smem:[#allocation2 + $0x2]] }
  0x1e   :  { %s132_s24 = sld [smem:[#allocation4 + $0x1]]  ;;  %s133_s25 = sld [smem:[#allocation2 + $0x80]] }
  0x1f   :  { %s134_s26 = sld [smem:[#allocation2 + $0x81]]  ;;  %s135_s27 = sld [smem:[#allocation2 + $0x82]] }
  0x20   :  { %s205_s30 = sld [smem:[#allocation4 + $0x2]]  ;;  %s207_s4 = sld [smem:[#allocation2 + $0x100]] }
  0x21   :  { %s209_s5 = sld [smem:[#allocation2 + $0x101]]  ;;  %s211_s6 = sld [smem:[#allocation2 + $0x102]] }
  0x22   :  { %v44_v2 = vstv %s40_s1  ;;  %s213_s7 = sld [smem:[#allocation4 + $0x3]]  ;;  %s215_s8 = sld [smem:[#allocation2 + $0x180]]  ;;  %v47_v4 = vstv %s130_s22 }
  0x23   :  { %v42_v1 = vstv %s41_s21  ;;  %v54_v5 = vstv %s131_s23  ;;  %s217_s9 = sld [smem:[#allocation2 + $0x181]]  ;;  %s219_s2 = sld [smem:[#allocation2 + $0x182]]  ;;  %v48_v6 = vmul.f32 %v47_v4, %v39_v0 }
  0x24   :  { %v43_v3 = vmul.f32 %v42_v1, %v39_v0  ;;  %v55_v7 = vmul.f32 %v54_v5, %v39_v0  ;;  %v63_v8 = vstv %s133_s25  ;;  %v65_v9 = vstv %s132_s24 }
  0x25   :  { %v64_v11 = vmul.f32 %v63_v8, %v39_v0  ;;  %v68_v12 = vstv %s134_s26  ;;  %v75_v13 = vstv %s135_s27  ;;  %v50_v14 = vrot.slane %v48_v6, 1 }
  0x26   :  { %v45_v10 = vadd.f32 %v44_v2, %v43_v3  ;;  %v57_v15 = vrot.slane %v55_v7, 2  ;;  %v69_v16 = vmul.f32 %v68_v12, %v39_v0  ;;  %v76_v17 = vmul.f32 %v75_v13, %v39_v0 }
  0x27   :  { %v66_v18 = vadd.f32 %v65_v9, %v64_v11  ;;  %v84_v19 = vstv %s207_s4  ;;  %v86_v20 = vstv %s205_s30  ;;  %v89_v21 = vstv %s209_s5 }
  0x28   :  { %v52_v22 = vadd.f32 %v50_v14, %v45_v10  ;;  %v71_v23 = vrot.slane %v69_v16, 1  ;;  %v78_v24 = vrot.slane %v76_v17, 2  ;;  %v85_v25 = vmul.f32 %v84_v19, %v39_v0 }
  0x29   :  { %v90_v26 = vmul.f32 %v89_v21, %v39_v0  ;;  %v96_v27 = vstv %s211_s6  ;;  %v105_v28 = vstv %s215_s8  ;;  %v107_v29 = vstv %s213_s7 }
  0x2a   :  { %v59_v30 = vadd.f32 %v57_v15, %v52_v22  ;;  %v73_v31 = vadd.f32 %v71_v23, %v66_v18  ;;  %v87_v32 = vadd.f32 %v86_v20, %v85_v25  ;;  %v97_v33 = vmul.f32 %v96_v27, %v39_v0 }
  0x2b   :  { %v92_v34 = vrot.slane %v90_v26, 1  ;;  %v106_v35 = vmul.f32 %v105_v28, %v39_v0  ;;  %v110_v36 = vstv %s217_s9  ;;  %v117_v37 = vstv %s219_s2 }
  0x2c   :  { %60 = vst [vmem:[%s244_s3] sm:$0x1] %v59_v30  ;;  %v80_v38 = vadd.f32 %v78_v24, %v73_v31  ;;  %v99_v39 = vrot.slane %v97_v33, 2  ;;  %v111_v40 = vmul.f32 %v110_v36, %v39_v0  ;;  %v118_v41 = vmul.f32 %v117_v37, %v39_v0 }
  0x2d   :  { %v94_v42 = vadd.f32 %v92_v34, %v87_v32  ;;  %v108_v43 = vadd.f32 %v107_v29, %v106_v35 }
  0x2e   :  { %81 = vst [vmem:[%s244_s3 + $0x1] sm:$0x1] %v80_v38  ;;  %v113_v44 = vrot.slane %v111_v40, 1  ;;  %v120_v45 = vrot.slane %v118_v41, 2 }
  0x2f   :  { %v101_v46 = vadd.f32 %v99_v39, %v94_v42 }
  0x30   :  { %v115_v47 = vadd.f32 %v113_v44, %v108_v43 }
  0x31   :  { %102 = vst [vmem:[%s244_s3 + $0x2] sm:$0x1] %v101_v46 }
  0x32   :  { %v122_v48 = vadd.f32 %v120_v45, %v115_v47 }
  0x34   :  { %123 = vst [vmem:[%s244_s3 + $0x3] sm:$0x1] %v122_v48 }
  0x35   :  { %128 = vsyncpa [#allocation3], 1 }
  0x36   :  { %129 = vsyncpa [#allocation5], 1 }

</bundles_post_ra>
